<compile_context>
chip_gen: v5e
topology: v5e:2x2
jax: 0.10.0
libtpu: 0.0.40
codegen_flags: <defaults>
</compile_context>

<pallas_src>
import math

import jax
import jax.numpy as jnp
from jax.experimental import pallas as pl
from jax.experimental.pallas import tpu as pltpu


def _round_up(x, m):
    return (x + m - 1) // m * m


# ---------------------------------------------------------------------------
# Kernels
# ---------------------------------------------------------------------------

def _embed_linear1_silu(t_ref, freqs_ref, w1_ref, b1_ref):
    """Sinusoidal embedding -> Linear1 -> SiLU; returns (TN, H_pad) float32."""
    cdt = w1_ref.dtype                       # MXU operand dtype (bf16)
    t = t_ref[...]                           # (TN, 1)      f32
    args = t * freqs_ref[...]                # (TN, half)   outer product via broadcast

    # cat([cos, sin], -1): lane-aligned column placement (half = 128 for the
    # default freq dim), so no XLU shuffle; lets Linear1 run as ONE K=2*half
    # MXU pass instead of two K=half passes.
    emb = jnp.concatenate([jnp.cos(args), jnp.sin(args)], axis=-1).astype(cdt)

    h = jnp.dot(emb, w1_ref[...], preferred_element_type=jnp.float32) + b1_ref[...]

    # SiLU: x * sigmoid(x), sigmoid(x) = 0.5 * (1 + tanh(x / 2))
    # -> a single EUP push per element (vs. exp + reciprocal).
    return h * (0.5 * jnp.tanh(0.5 * h) + 0.5)


def _te_kernel_pipelined(t_ref, freqs_ref, w1_ref, b1_ref, w2_ref, b2_ref,
                         out_ref):
    """Multi-row-tile path: weights VMEM-resident via constant index maps."""
    cdt = w1_ref.dtype
    h = _embed_linear1_silu(t_ref, freqs_ref, w1_ref, b1_ref)
    out = jnp.dot(h.astype(cdt), w2_ref[...],
                  preferred_element_type=jnp.float32) + b2_ref[...]
    out_ref[...] = out.astype(out_ref.dtype)


def _te_kernel_single(t_ref, freqs_ref, w1_ref, b1_ref, w2_hbm, b2_ref,
                      out_ref, w2_vmem, dma_sem):
    """Single-grid-step path: overlap the w2 HBM->VMEM copy with Linear1."""
    cdt = w1_ref.dtype
    copy = pltpu.make_async_copy(w2_hbm, w2_vmem, dma_sem)
    copy.start()
    h = _embed_linear1_silu(t_ref, freqs_ref, w1_ref, b1_ref)
    copy.wait()
    out = jnp.dot(h.astype(cdt), w2_vmem[...],
                  preferred_element_type=jnp.float32) + b2_ref[...]
    out_ref[...] = out.astype(out_ref.dtype)


# ---------------------------------------------------------------------------
# Wrappers
# ---------------------------------------------------------------------------

def prepare_timestep_embedder_params(w1, b1, w2, b2, *,
                                     frequency_embedding_size=256,
                                     max_period=10000,
                                     compute_dtype=jnp.bfloat16):
    """Pad/cast the MLP parameters ONCE (init time), not on every forward."""
    assert frequency_embedding_size % 2 == 0, "odd freq dim unsupported"
    # TODO(synk): odd frequency_embedding_size (trailing zero column) not implemented.
    hidden_size = w2.shape[1]
    assert w1.shape == (frequency_embedding_size, hidden_size)
    assert w2.shape == (hidden_size, hidden_size)
    half = frequency_embedding_size // 2
    h_pad = _round_up(hidden_size, 128)

    freqs = jnp.exp(
        -math.log(max_period) * jnp.arange(half, dtype=jnp.float32) / half
    ).reshape(1, half)

    if h_pad == hidden_size:
        w1p = w1.astype(compute_dtype)
        w2p = w2.astype(compute_dtype)
        b1p = b1.astype(jnp.float32).reshape(1, hidden_size)
        b2p = b2.astype(jnp.float32).reshape(1, hidden_size)
    else:
        # Zero padding is exact: padded hidden columns yield h == 0 after
        # Linear1 + SiLU, and the corresponding zero rows of w2 keep them out
        # of the output.
        w1p = jnp.zeros((frequency_embedding_size, h_pad), compute_dtype)
        w1p = w1p.at[:, :hidden_size].set(w1.astype(compute_dtype))
        w2p = jnp.zeros((h_pad, h_pad), compute_dtype)
        w2p = w2p.at[:hidden_size, :hidden_size].set(w2.astype(compute_dtype))
        b1p = jnp.zeros((1, h_pad), jnp.float32)
        b1p = b1p.at[0, :hidden_size].set(b1.astype(jnp.float32))
        b2p = jnp.zeros((1, h_pad), jnp.float32)
        b2p = b2p.at[0, :hidden_size].set(b2.astype(jnp.float32))

    return {"freqs": freqs, "w1": w1p, "b1": b1p, "w2": w2p, "b2": b2p,
            "hidden_size": hidden_size, "h_pad": h_pad}


def timestep_embedder(t, params, *, tile_n=256, out_dtype=jnp.float32):
    """t: (N,) float timesteps; params from prepare_timestep_embedder_params.
    Returns (N, hidden_size) in out_dtype, matching TimestepEmbedder.forward."""
    freqs = params["freqs"]
    w1p, b1p, w2p, b2p = params["w1"], params["b1"], params["w2"], params["b2"]
    hidden_size, h_pad = params["hidden_size"], params["h_pad"]
    half = freqs.shape[1]
    cdt = w1p.dtype
    n = t.shape[0]

    # Adaptive row tiling: round small batches up to a multiple of 16 instead
    # of a full 128/256-row tile; large batches get tile_n-row pipelined tiles.
    if n <= tile_n:
        tile_rows = max(16, _round_up(n, 16))
        n_pad = tile_rows
    else:
        tile_rows = tile_n
        n_pad = _round_up(n, tile_rows)
    grid_steps = n_pad // tile_rows
    # TODO(synk): when grid_steps == 1 on v7x, a second (column-parallel) grid
    # axis over w2's output columns would engage the second TensorCore.

    t2d = t.astype(jnp.float32).reshape(n, 1)
    if n_pad != n:
        t2d = jnp.pad(t2d, ((0, n_pad - n), (0, 0)))

    const2d = lambda arr: pl.BlockSpec(arr.shape, lambda i: (0, 0))
    itemsize = jnp.dtype(cdt).itemsize
    out_itemsize = jnp.dtype(out_dtype).itemsize

    cost = pl.CostEstimate(
        flops=2 * n_pad * (2 * half * h_pad + h_pad * h_pad),
        transcendentals=n_pad * (2 * half + h_pad),
        bytes_accessed=(t2d.nbytes + freqs.nbytes + w1p.nbytes + w2p.nbytes
                        + b1p.nbytes + b2p.nbytes + n_pad * h_pad * out_itemsize),
    )

    # Rough VMEM budget (w2 single-buffered on the manual-copy path, other
    # inputs double-buffered) + per-tile activations.  Only raise the scoped
    # limit when we would exceed the conservative 16 MiB default.
    weight_bytes = 2 * (w1p.nbytes + b1p.nbytes + b2p.nbytes)
    weight_bytes += (1 if grid_steps == 1 else 2) * w2p.nbytes
    act_bytes = tile_rows * (2 * half * itemsize + 3 * h_pad * 4
                             + 2 * h_pad * out_itemsize)
    vmem_est = weight_bytes + act_bytes + (1 << 20)
    vmem_limit = None
    if vmem_est > (16 << 20):
        vmem_limit = min(int(vmem_est * 1.25), 96 << 20)
        # TODO(synk): for h_pad >= ~4096 (v7x 64 MiB VMEM) tile w2 over its
        # output columns with a second grid axis instead of full residency.

    compiler_params = pltpu.CompilerParams(
        dimension_semantics=("parallel",),
        vmem_limit_bytes=vmem_limit,
    )

    out_shape = jax.ShapeDtypeStruct((n_pad, h_pad), out_dtype)
    row_spec = pl.BlockSpec((tile_rows, 1), lambda i: (i, 0))
    out_spec = pl.BlockSpec((tile_rows, h_pad), lambda i: (i, 0))

    if grid_steps == 1:
        # No pipelining available to hide weight DMAs: fetch w2 manually inside
        # the kernel, overlapped with cos/sin + Linear1 + SiLU.
        out = pl.pallas_call(
            _te_kernel_single,
            out_shape=out_shape,
            grid=(1,),
            in_specs=[row_spec, const2d(freqs), const2d(w1p), const2d(b1p),
                      pl.BlockSpec(memory_space=pl.ANY),   # w2 stays in HBM
                      const2d(b2p)],
            out_specs=out_spec,
            scratch_shapes=[pltpu.VMEM((h_pad, h_pad), cdt),
                            pltpu.SemaphoreType.DMA],
            compiler_params=compiler_params,
            cost_estimate=cost,
        )(t2d, freqs, w1p, b1p, w2p, b2p)
    else:
        out = pl.pallas_call(
            _te_kernel_pipelined,
            out_shape=out_shape,
            grid=(grid_steps,),
            in_specs=[row_spec, const2d(freqs), const2d(w1p), const2d(b1p),
                      const2d(w2p), const2d(b2p)],
            out_specs=out_spec,
            compiler_params=compiler_params,
            cost_estimate=cost,
        )(t2d, freqs, w1p, b1p, w2p, b2p)

    if n_pad != n or h_pad != hidden_size:
        out = out[:n, :hidden_size]
    return out


def timestep_embedder_from_weights(t, w1, b1, w2, b2, *,
                                   frequency_embedding_size=256,
                                   max_period=10000,
                                   compute_dtype=jnp.bfloat16, **kwargs):
    """One-shot helper; in real use call prepare_* once and reuse the params."""
    params = prepare_timestep_embedder_params(
        w1, b1, w2, b2, frequency_embedding_size=frequency_embedding_size,
        max_period=max_period, compute_dtype=compute_dtype)
    return timestep_embedder(t, params, **kwargs)


# ---------------------------------------------------------------------------
# Reference + test
# ---------------------------------------------------------------------------

def reference(t, w1, b1, w2, b2, frequency_embedding_size=256, max_period=10000):
    half = frequency_embedding_size // 2
    freqs = jnp.exp(-math.log(max_period)
                    * jnp.arange(half, dtype=jnp.float32) / half)
    args = t.astype(jnp.float32)[:, None] * freqs[None]
    emb = jnp.concatenate([jnp.cos(args), jnp.sin(args)], axis=-1)
    h = emb @ w1 + b1
    h = h * jax.nn.sigmoid(h)
    return h @ w2 + b2


if __name__ == "__main__":
    hidden_size = 32
    freq_dim = 256
    batch = 8

    key = jax.random.PRNGKey(0)
    k_t, k_w1, k_b1, k_w2, k_b2 = jax.random.split(key, 5)

    # nn.Linear(256 -> hidden) and nn.Linear(hidden -> hidden), stored (in, out).
    w1 = jax.random.normal(k_w1, (freq_dim, hidden_size), jnp.float32) * 0.02
    b1 = jax.random.normal(k_b1, (hidden_size,), jnp.float32) * 0.02
    w2 = jax.random.normal(k_w2, (hidden_size, hidden_size), jnp.float32) * 0.02
    b2 = jax.random.normal(k_b2, (hidden_size,), jnp.float32) * 0.02

    # Fractional timesteps, one per batch element.
    t = jax.random.uniform(k_t, (batch,), jnp.float32, 0.0, 1000.0)

    # Parameters prepared once (padding + bf16 cast hoisted off the per-call
    # path) and reused for every forward call.
    params = prepare_timestep_embedder_params(
        w1, b1, w2, b2, frequency_embedding_size=freq_dim)

    out = timestep_embedder(t, params)
    out = jax.block_until_ready(out)

    ref = reference(t, w1, b1, w2, b2, frequency_embedding_size=freq_dim)
    assert out.shape == (batch, hidden_size), out.shape
    max_err = float(jnp.max(jnp.abs(out - ref)))
    # bf16 MXU operands => slightly looser tolerance than the pure-f32 reference.
    assert jnp.allclose(out, ref, atol=1e-2, rtol=1e-2), f"max err {max_err}"

    print("KERNEL_OK")
</pallas_src>

<mosaic_0001>
module attributes {stable_mosaic.version = 11 : i64} {
  func.func @_te_kernel_single(%arg0: i32, %arg1: memref<16x1xf32, #tpu.memory_space<vmem>>, %arg2: memref<1x128xf32, #tpu.memory_space<vmem>>, %arg3: memref<256x128xbf16, #tpu.memory_space<vmem>>, %arg4: memref<1x128xf32, #tpu.memory_space<vmem>>, %arg5: memref<128x128xbf16, #tpu.memory_space<any>>, %arg6: memref<1x128xf32, #tpu.memory_space<vmem>>, %arg7: memref<16x128xf32, #tpu.memory_space<vmem>>, %arg8: memref<128x128xbf16, #tpu.memory_space<vmem>>, %arg9: memref<!tpu.dma_semaphore, #tpu.memory_space<semaphore_mem>>) attributes {dimension_semantics = [#tpu.dimension_semantics<parallel>], iteration_bounds = array<i64: 1>, scalar_prefetch = 0 : i64, scratch_operands = 2 : i64, tpu.core_type = #tpu.core_type<tc>, window_params = [{transform_indices = @transform_0, window_bounds = array<i64: 16, 1>}, {pipeline_mode = #tpu.pipeline_mode<synchronous>, transform_indices = @transform_1, window_bounds = array<i64: 1, 128>}, {pipeline_mode = #tpu.pipeline_mode<synchronous>, transform_indices = @transform_2, window_bounds = array<i64: 256, 128>}, {pipeline_mode = #tpu.pipeline_mode<synchronous>, transform_indices = @transform_3, window_bounds = array<i64: 1, 128>}, {}, {pipeline_mode = #tpu.pipeline_mode<synchronous>, transform_indices = @transform_5, window_bounds = array<i64: 1, 128>}, {transform_indices = @transform_6, window_bounds = array<i64: 16, 128>}]} {
    tpu.enqueue_dma source(%arg5 : memref<128x128xbf16, #tpu.memory_space<any>>) target(%arg8 : memref<128x128xbf16, #tpu.memory_space<vmem>>) target_semaphore(%arg9 : memref<!tpu.dma_semaphore, #tpu.memory_space<semaphore_mem>>)
    %c0 = arith.constant 0 : index
    %c0_0 = arith.constant 0 : index
    %0 = vector.load %arg1[%c0, %c0_0] : memref<16x1xf32, #tpu.memory_space<vmem>>, vector<16x1xf32>
    %c0_1 = arith.constant 0 : index
    %c0_2 = arith.constant 0 : index
    %1 = vector.load %arg2[%c0_1, %c0_2] : memref<1x128xf32, #tpu.memory_space<vmem>>, vector<1x128xf32>
    %2 = vector.broadcast %0 : vector<16x1xf32> to vector<16x128xf32>
    %3 = vector.broadcast %1 : vector<1x128xf32> to vector<16x128xf32>
    %4 = arith.mulf %2, %3 : vector<16x128xf32>
    %5 = math.cos %4 : vector<16x128xf32>
    %6 = math.sin %4 : vector<16x128xf32>
    %7 = tpu.concatenate %5, %6 in 1 : vector<16x128xf32>, vector<16x128xf32> -> vector<16x256xf32>
    %8 = arith.truncf %7 : vector<16x256xf32> to vector<16x256xbf16>
    %c0_3 = arith.constant 0 : index
    %c0_4 = arith.constant 0 : index
    %9 = vector.load %arg3[%c0_3, %c0_4] : memref<256x128xbf16, #tpu.memory_space<vmem>>, vector<256x128xbf16>
    %cst = arith.constant dense<0.000000e+00> : vector<16x128xf32>
    %10 = tpu.matmul %8, %9, %cst {dimension_numbers = #tpu.dot_dimension_numbers<[1], [0], [0], [1], [0, 0, 1, 1], [], []>} : vector<16x256xbf16>, vector<256x128xbf16>, vector<16x128xf32> -> vector<16x128xf32>
    %c0_5 = arith.constant 0 : index
    %c0_6 = arith.constant 0 : index
    %11 = vector.load %arg4[%c0_5, %c0_6] : memref<1x128xf32, #tpu.memory_space<vmem>>, vector<1x128xf32>
    %12 = vector.broadcast %11 : vector<1x128xf32> to vector<16x128xf32>
    %13 = arith.addf %10, %12 : vector<16x128xf32>
    %cst_7 = arith.constant 5.000000e-01 : f32
    %14 = vector.broadcast %cst_7 : f32 to vector<16x128xf32>
    %15 = arith.mulf %14, %13 : vector<16x128xf32>
    %16 = math.tanh %15 : vector<16x128xf32>
    %cst_8 = arith.constant 5.000000e-01 : f32
    %17 = vector.broadcast %cst_8 : f32 to vector<16x128xf32>
    %18 = arith.mulf %17, %16 : vector<16x128xf32>
    %cst_9 = arith.constant 5.000000e-01 : f32
    %19 = vector.broadcast %cst_9 : f32 to vector<16x128xf32>
    %20 = arith.addf %18, %19 : vector<16x128xf32>
    %21 = arith.mulf %13, %20 : vector<16x128xf32>
    tpu.wait_dma2 semaphore(%arg9 : memref<!tpu.dma_semaphore, #tpu.memory_space<semaphore_mem>>) src(%arg5 : memref<128x128xbf16, #tpu.memory_space<any>>) dst(%arg8 : memref<128x128xbf16, #tpu.memory_space<vmem>>)
    %22 = arith.truncf %21 : vector<16x128xf32> to vector<16x128xbf16>
    %c0_10 = arith.constant 0 : index
    %c0_11 = arith.constant 0 : index
    %23 = vector.load %arg8[%c0_10, %c0_11] : memref<128x128xbf16, #tpu.memory_space<vmem>>, vector<128x128xbf16>
    %cst_12 = arith.constant dense<0.000000e+00> : vector<16x128xf32>
    %24 = tpu.matmul %22, %23, %cst_12 {dimension_numbers = #tpu.dot_dimension_numbers<[1], [0], [0], [1], [0, 0, 1, 1], [], []>} : vector<16x128xbf16>, vector<128x128xbf16>, vector<16x128xf32> -> vector<16x128xf32>
    %c0_13 = arith.constant 0 : index
    %c0_14 = arith.constant 0 : index
    %25 = vector.load %arg6[%c0_13, %c0_14] : memref<1x128xf32, #tpu.memory_space<vmem>>, vector<1x128xf32>
    %26 = vector.broadcast %25 : vector<1x128xf32> to vector<16x128xf32>
    %27 = arith.addf %24, %26 : vector<16x128xf32>
    %c0_15 = arith.constant 0 : index
    %c0_16 = arith.constant 0 : index
    %28 = vector.load %arg7[%c0_15, %c0_16] : memref<16x128xf32, #tpu.memory_space<vmem>>, vector<16x128xf32>
    tpu.vector_store %arg7[%c0_15, %c0_16], %27 {strides = array<i32>} : memref<16x128xf32, #tpu.memory_space<vmem>>, vector<16x128xf32>,
    return
  }
  func.func @transform_0(%arg0: i32) -> (i32, i32) {
    %c0_i32 = arith.constant 0 : i32
    %c0_i32_0 = arith.constant 0 : i32
    return %arg0, %c0_i32 : i32, i32
  }
  func.func @transform_1(%arg0: i32) -> (i32, i32) {
    %c0_i32 = arith.constant 0 : i32
    %c0_i32_0 = arith.constant 0 : i32
    %c0_i32_1 = arith.constant 0 : i32
    return %c0_i32, %c0_i32_0 : i32, i32
  }
  func.func @transform_2(%arg0: i32) -> (i32, i32) {
    %c0_i32 = arith.constant 0 : i32
    %c0_i32_0 = arith.constant 0 : i32
    %c0_i32_1 = arith.constant 0 : i32
    return %c0_i32, %c0_i32_0 : i32, i32
  }
  func.func @transform_3(%arg0: i32) -> (i32, i32) {
    %c0_i32 = arith.constant 0 : i32
    %c0_i32_0 = arith.constant 0 : i32
    %c0_i32_1 = arith.constant 0 : i32
    return %c0_i32, %c0_i32_0 : i32, i32
  }
  func.func @transform_5(%arg0: i32) -> (i32, i32) {
    %c0_i32 = arith.constant 0 : i32
    %c0_i32_0 = arith.constant 0 : i32
    %c0_i32_1 = arith.constant 0 : i32
    return %c0_i32, %c0_i32_0 : i32, i32
  }
  func.func @transform_6(%arg0: i32) -> (i32, i32) {
    %c0_i32 = arith.constant 0 : i32
    %c0_i32_0 = arith.constant 0 : i32
    return %arg0, %c0_i32 : i32, i32
  }
}

</mosaic_0001>

<bundles_post_ra>
// kernel: tpu_custom_call.1
= control target key start
LH: loop header
LB: loop body
LE: loop exit
PB: predicated region body
PF: predicated region fallthrough
CT: control target
= control target key end

     0   :  { %11 = vsyncpa [#allocation5], 0  ;;  %s1493_s0 = inlined_call_operand.vmem [shape: f32[16,1], index: 0, kind: input, shape index: {}]   ;;  %s1494_s1 = inlined_call_operand.vmem [shape: f32[1,128], index: 1, kind: input, shape index: {}]   ;;  %s1495_s2 = inlined_call_operand.hbm [shape: bf16[256,128], index: 2, kind: input, shape index: {}]   ;;  %s1496_s3 = inlined_call_operand.vmem [shape: f32[1,128], index: 3, kind: input, shape index: {}]   ;;  %s1497_s4 = inlined_call_operand.hbm [shape: bf16[128,128], index: 4, kind: input, shape index: {}]   ;;  %s1498_s5 = inlined_call_operand.vmem [shape: f32[1,128], index: 5, kind: input, shape index: {}]   ;;  %s1499_s6 = inlined_call_operand.hbm [shape: f32[16,128], index: 6, kind: output, shape index: {}]  }
   0x1   :  { %12 = vsyncpa [#allocation6], 0  ;;  %s21_s23 = sshll.u32 %s1495_s2, 4  ;;  %s1206_s24 = smov [#allocation4]   ;;  %s22_s23 = int_to_ptr.hbm [resolvable:$true] %s21_s23 }
   0x2   :  { %s23_s25 = sshll.u32 %s1206_s24, 4  ;;  %s1207_s26 = smov 64   ;;  %s24_s25 = int_to_ptr.vmem [resolvable:$true] %s23_s25 }
   0x3   :  { %s1208_s27 = smov 4  }
   0x4   :  { %29 = dma.hbm_to_vmem [thread:$0]  %s22_s23, 2048, %s24_s25, [#allocation5], %s1207_s26, %s1207_s26, %s1208_s27  }
   0x5   :  { %1200 = dma.done.wait [#allocation5], 2048  }
   0x6   :  { %1201 = vsyncadd [#allocation5], 4294965248  ;;  %v1209_v0 = vmov 0   ;;  %v51_v1 = vld [vmem:[%s1493_s0] sm:$0xff]  ;;  %v52_v2 = vld [vmem:[%s1493_s0 + $0x8] sm:$0xff]  ;;  %s45_s9 = sshll.u32 %s1497_s4, 4  ;;  %s46_s9 = int_to_ptr.hbm [resolvable:$true] %s45_s9 }
   0x7   :  { %1120 = vset.pattern.permute.xlu0 %v1209_v0  ;;  %v1121_v3 = vld [vmem:[%s1494_s1] ss:$0 sm:$0xff]  ;;  %v1089_v19 = vld [vmem:[#allocation4 + $0x38] sm:$0xff]  ;;  %v1210_v25 = vmov 683565275   ;;  %v1088_v30 = vld [vmem:[#allocation4 + $0x30] sm:$0xff] }
   0x8   :  { %56 = vperm.xlu0 %1120, %v51_v1   ;;  %v1097_v20 = vld [vmem:[#allocation4 + $0x78] sm:$0xff]  ;;  %v1211_v27 = vmov 2475754826   ;;  %821 = vmatpush.bf16.msra.mxu0 %v1089_v19  ;;  %v1096_v31 = vld [vmem:[#allocation4 + $0x70] sm:$0xff]  ;;  %v1212_v33 = vmov 2131351028  }
   0x9   :  { %835 = vmatpush.bf16.msra.mxu1 %v1097_v20  ;;  %v1213_v36 = vmov 2102212464   ;;  %v1214_v39 = vmov 920167782   ;;  %v1215_v42 = vmov 1326507024  }
   0xa   :  { %v1087_v50 = vld [vmem:[#allocation4 + $0x28] sm:$0xff]  ;;  %v1086_v63 = vld [vmem:[#allocation4 + $0x20] sm:$0xff]  ;;  %s1216_s10 = smov [#allocation2]  }
   0xb   :  { %v1095_v51 = vld [vmem:[#allocation4 + $0x68] sm:$0xff]  ;;  %v1094_v1 = vld [vmem:[#allocation4 + $0x60] sm:$0xff]  ;;  %s47_s11 = sshll.u32 %s1216_s10, 4  ;;  %s48_s11 = int_to_ptr.vmem [resolvable:$true] %s47_s11 }
   0xc   :  { %822 = vmatpush.bf16.msra.mxu0 %v1088_v30  ;;  %50 = dma.hbm_to_vmem [thread:$0]  %s46_s9, 1024, %s48_s11, [#allocation3] }
   0xd   :  { %836 = vmatpush.bf16.msra.mxu1 %v1096_v31 }
  0x10   :  { %61 = vperm.xlu0 %1120, %v52_v2   ;;  %823 = vmatpush.bf16.msra.mxu0 %v1087_v50 }
  0x11   :  { %837 = vmatpush.bf16.msra.mxu1 %v1095_v51 }
  0x14   :  { %824 = vmatpush.bf16.msra.mxu0 %v1086_v63 }
  0x15   :  { %838 = vmatpush.bf16.msra.mxu1 %v1094_v1 }
  0x7a   :  { %v57_v4 = vpop.permute.xlu0 %56 }
  0x7b   :  { %v1268_v5 = vmul.f32 %v1121_v3, %v57_v4 }
  0x7d   :  { %v69_v6 = vand.u32 2147483647, %v1268_v5  ;;  %v72_v7 = vand.u32 2139095040, %v1268_v5 }
  0x7f   :  { %v73_v8 = vshrl.u32 %v72_v7, 23  ;;  %v76_v10 = vand.u32 8388607, %v69_v6 }
  0x81   :  { %v973_v9 = vadd.s32 4294967169, %v73_v8  ;;  %v77_v14 = vor.u32 8388608, %v76_v10 }
  0x82   :  { %v62_v11 = vpop.permute.xlu0 %61 }
  0x83   :  { %v79_v12 = vadd.s32 1, %v973_v9  ;;  %v1274_v13 = vmul.f32 %v1121_v3, %v62_v11  ;;  %v1278_v22 = vshll.u32 %v77_v14, 8 }
  0x85   :  { %vm80_vm0 = vcmp.gt.s32.totalorder %v79_v12, 0  ;;  %v223_v16 = vand.u32 2147483647, %v1274_v13  ;;  %v226_v17 = vand.u32 2139095040, %v1274_v13  ;;  %v1314_v4 = vand.u32 65535, %v1278_v22 }
  0x86   :  { %v81_v15 = vsel %vm80_vm0, %v79_v12, 0  ;;  %v1326_v14 = vshrl.u32 %v1278_v22, 16 }
  0x87   :  { %v83_v18 = vand.u32 31, %v81_v15  ;;  %v227_v23 = vshrl.u32 %v226_v17, 23  ;;  %v1280_v24 = vshrl.u32 %v81_v15, 5  ;;  %v230_v29 = vand.u32 8388607, %v223_v16  ;;  %v1085_v17 = vld [vmem:[#allocation4 + $0x18] sm:$0xff] }
  0x88   :  { %825 = vmatpush.bf16.msra.mxu0 %v1085_v17 }
  0x89   :  { %v84_v21 = vsub.s32 32, %v83_v18  ;;  %v86_v26 = vshll.u32 %v1210_v25, %v83_v18  ;;  %v89_v28 = vshll.u32 %v1211_v27, %v83_v18  ;;  %v92_v35 = vshll.u32 %v1212_v33, %v83_v18 }
  0x8a   :  { %v95_v38 = vshll.u32 %v1213_v36, %v83_v18  ;;  %v98_v41 = vshll.u32 %v1214_v39, %v83_v18  ;;  %v976_v47 = vadd.s32 4294967169, %v227_v23  ;;  %vm101_vm1 = vcmp.lt.s32.totalorder %v1280_v24, 1 }
  0x8b   :  { %v87_v32 = vshrl.u32 %v1211_v27, %v84_v21  ;;  %v90_v34 = vshrl.u32 %v1212_v33, %v84_v21  ;;  %v93_v37 = vshrl.u32 %v1213_v36, %v84_v21  ;;  %v96_v40 = vshrl.u32 %v1214_v39, %v84_v21 }
  0x8c   :  { %v99_v43 = vshrl.u32 %v1215_v42, %v84_v21  ;;  %vm104_vm2 = vcmp.lt.s32.totalorder %v1280_v24, 4  ;;  %vm102_vm3 = vcmp.lt.s32.totalorder %v1280_v24, 2  ;;  %vm103_vm4 = vcmp.lt.s32.totalorder %v1280_v24, 3 }
  0x8d   :  { %v88_v44 = vor.u32 %v87_v32, %v86_v26  ;;  %v91_v45 = vor.u32 %v90_v34, %v89_v28  ;;  %v94_v46 = vor.u32 %v93_v37, %v92_v35  ;;  %v97_v48 = vor.u32 %v96_v40, %v95_v38  ;;  %v1084_v40 = vld [vmem:[#allocation4 + $0x10] sm:$0xff] }
  0x8e   :  { %v100_v49 = vor.u32 %v99_v43, %v98_v41  ;;  %v231_v56 = vor.u32 8388608, %v230_v29  ;;  %v233_v57 = vadd.s32 1, %v976_v47  ;;  %v85_v58 = vshrl.u32 %v1210_v25, %v84_v21  ;;  %v1093_v21 = vld [vmem:[#allocation4 + $0x58] sm:$0xff]  ;;  %826 = vmatpush.bf16.msra.mxu0 %v1084_v40 }
  0x8f   :  { %v106_v52 = vsel %vm104_vm2, %v94_v46, 2102212464  ;;  %v113_v53 = vsel %vm101_vm1, %v91_v45, %v94_v46  ;;  %v110_v54 = vsel %vm104_vm2, %v97_v48, 920167782  ;;  %v109_v59 = vsel %vm101_vm1, %v88_v44, %v91_v45  ;;  %839 = vmatpush.bf16.msra.mxu1 %v1093_v21 }
  0x90   :  { %v114_v55 = vsel %vm104_vm2, %v100_v49, 1326507024  ;;  %v111_v60 = vsel %vm103_vm4, %v94_v46, %v110_v54  ;;  %vm234_vm5 = vcmp.gt.s32.totalorder %v233_v57, 0  ;;  %v105_v2 = vsel %vm101_vm1, %v85_v58, %v88_v44 }
  0x91   :  { %v115_v61 = vsel %vm103_vm4, %v97_v48, %v114_v55  ;;  %v107_v3 = vsel %vm103_vm4, %v91_v45, %v106_v52  ;;  %v1318_v8 = vsel %vm102_vm3, %v109_v59, %v111_v60  ;;  %v235_v10 = vsel %vm234_vm5, %v233_v57, 0  ;;  %v1092_v45 = vld [vmem:[#allocation4 + $0x50] sm:$0xff]  ;;  %v1083_v52 = vld [vmem:[#allocation4 + $0x8] sm:$0xff] }
  0x92   :  { %v116_v62 = vsel %vm102_vm3, %v113_v53, %v115_v61  ;;  %v1320_v11 = vshll.u32 %v231_v56, 8  ;;  %v237_v15 = vand.u32 31, %v235_v10  ;;  %v1330_v18 = vsel %vm102_vm3, %v105_v2, %v107_v3  ;;  %v1091_v56 = vld [vmem:[#allocation4 + $0x48] sm:$0xff]  ;;  %827 = vmatpush.bf16.msra.mxu0 %v1083_v52 }
  0x93   :  { %v121_v7 = vshrl.u32 %v116_v62, 16  ;;  %v120_v9 = vand.u32 65535, %v116_v62  ;;  %v142_v19 = vand.u32 65535, %v1318_v8  ;;  %v143_v20 = vshrl.u32 %v1318_v8, 16  ;;  %840 = vmatpush.bf16.msra.mxu1 %v1092_v45 }
  0x94   :  { %v1336_v28 = vsub.s32 32, %v237_v15  ;;  %v1339_v29 = vand.u32 65535, %v1320_v11  ;;  %v1342_v31 = vshrl.u32 %v235_v10, 5  ;;  %v240_v24 = vshll.u32 %v1210_v25, %v237_v15  ;;  %v1090_v10 = vld [vmem:[#allocation4 + $0x40] sm:$0xff] }
  0x95   :  { %v1323_v12 = vmul.u32 %v121_v7, %v1314_v4  ;;  %v122_v23 = vmul.u32 %v120_v9, %v1314_v4  ;;  %v125_v26 = vmul.u32 %v121_v7, %v1326_v14  ;;  %v243_v32 = vshll.u32 %v1211_v27, %v237_v15  ;;  %v1082_v7 = vld [vmem:[#allocation4] sm:$0xff] }
  0x96   :  { %v241_v34 = vshrl.u32 %v1211_v27, %v1336_v28  ;;  %v244_v35 = vshrl.u32 %v1212_v33, %v1336_v28  ;;  %v246_v37 = vshll.u32 %v1212_v33, %v237_v15  ;;  %v247_v38 = vshrl.u32 %v1213_v36, %v1336_v28  ;;  %828 = vmatpush.bf16.msra.mxu0 %v1082_v7 }
  0x97   :  { %v126_v30 = vshll.u32 %v1323_v12, 16  ;;  %v249_v41 = vshll.u32 %v1213_v36, %v237_v15  ;;  %v250_v43 = vshrl.u32 %v1214_v39, %v1336_v28  ;;  %v252_v44 = vshll.u32 %v1214_v39, %v237_v15  ;;  %841 = vmatpush.bf16.msra.mxu1 %v1091_v56 }
  0x98   :  { %v253_v27 = vshrl.u32 %v1215_v42, %v1336_v28  ;;  %v1359_v46 = vor.u32 %v241_v34, %v240_v24  ;;  %v1361_v33 = vor.u32 %v244_v35, %v243_v32  ;;  %v1363_v47 = vor.u32 %v247_v38, %v246_v37 }
  0x99   :  { %v1366_v48 = vmul.u32 %v120_v9, %v1326_v14  ;;  %vm1368_vm6 = vc.u32 %v122_v23, %v126_v30  ;;  %v251_v49 = vor.u32 %v250_v43, %v249_v41  ;;  %vm255_vm7 = vcmp.lt.s32.totalorder %v1342_v31, 1 }
  0x9a   :  { %v254_v39 = vor.u32 %v253_v27, %v252_v44  ;;  %v1374_v42 = vmul.u32 %v143_v20, %v1314_v4  ;;  %vm258_vm8 = vcmp.lt.s32.totalorder %v1342_v31, 4  ;;  %v263_v50 = vsel %vm255_vm7, %v1359_v46, %v1361_v33 }
  0x9b   :  { %v267_v51 = vsel %vm255_vm7, %v1361_v33, %v1363_v47  ;;  %v132_v53 = vadd.s32 %v126_v30, %v122_v23  ;;  %vm257_vm9 = vcmp.lt.s32.totalorder %v1342_v31, 3  ;;  %v264_v54 = vsel %vm258_vm8, %v251_v49, 920167782  ;;  %842 = vmatpush.bf16.msra.mxu1 %v1090_v10 }
  0x9c   :  { %v268_v55 = vsel %vm258_vm8, %v254_v39, 1326507024  ;;  %vm256_vm10 = vcmp.lt.s32.totalorder %v1342_v31, 2  ;;  %v265_v57 = vsel %vm257_vm9, %v1363_v47, %v264_v54  ;;  %v131_v59 = vsel %vm1368_vm6, 1, %v1209_v0 }
  0x9d   :  { %v269_v58 = vsel %vm257_vm9, %v251_v49, %v268_v55  ;;  %v266_v60 = vsel %vm256_vm10, %v263_v50, %v265_v57  ;;  %v128_v62 = vshll.u32 %v1366_v48, 16  ;;  %v146_v63 = vmul.u32 %v142_v19, %v1326_v14 }
  0x9e   :  { %v270_v61 = vsel %vm256_vm10, %v267_v51, %v269_v58  ;;  %v273_v1 = vshrl.u32 %v1320_v11, 16  ;;  %v133_v8 = vadd.s32 %v131_v59, %v125_v26  ;;  %v297_v9 = vshrl.u32 %v266_v60, 16 }
  0x9f   :  { %v274_v2 = vand.u32 65535, %v270_v61  ;;  %v275_v3 = vshrl.u32 %v270_v61, 16  ;;  %vm134_vm11 = vc.u32 %v132_v53, %v128_v62  ;;  %v144_v15 = vmul.u32 %v142_v19, %v1314_v4 }
  0xa0   :  { %v148_v17 = vshll.u32 %v1374_v42, 16  ;;  %v147_v21 = vmul.u32 %v143_v20, %v1326_v14  ;;  %v296_v30 = vand.u32 65535, %v266_v60  ;;  %v127_v24 = vshrl.u32 %v1323_v12, 16 }
  0xa1   :  { %v277_v23 = vmul.u32 %v275_v3, %v1339_v29  ;;  %v276_v32 = vmul.u32 %v274_v2, %v1339_v29  ;;  %v135_v34 = vsel %vm134_vm11, 1, %v1209_v0  ;;  %v150_v26 = vshll.u32 %v146_v63, 16 }
  0xa2   :  { %vm152_vm12 = vc.u32 %v144_v15, %v148_v17  ;;  %v137_v37 = vadd.s32 %v135_v34, %v133_v8  ;;  %v154_v19 = vadd.s32 %v148_v17, %v144_v15  ;;  %v299_v38 = vmul.u32 %v297_v9, %v1339_v29 }
  0xa3   :  { %v280_v35 = vshll.u32 %v277_v23, 16  ;;  %v153_v4 = vsel %vm152_vm12, 1, %v1209_v0  ;;  %v129_v14 = vshrl.u32 %v1366_v48, 16  ;;  %v278_v40 = vmul.u32 %v274_v2, %v273_v1 }
  0xa4   :  { %v155_v20 = vadd.s32 %v153_v4, %v147_v21  ;;  %v138_v41 = vadd.s32 %v137_v37, %v127_v24  ;;  %vm156_vm14 = vc.u32 %v154_v19, %v150_v26  ;;  %v279_v43 = vmul.u32 %v275_v3, %v273_v1 }
  0xa5   :  { %vm284_vm13 = vc.u32 %v276_v32, %v280_v35  ;;  %v286_v12 = vadd.s32 %v280_v35, %v276_v32  ;;  %v149_v44 = vshrl.u32 %v1374_v42, 16  ;;  %v157_v27 = vsel %vm156_vm14, 1, %v1209_v0 }
  0xa6   :  { %v282_v45 = vshll.u32 %v278_v40, 16  ;;  %v159_v36 = vadd.s32 %v157_v27, %v155_v20  ;;  %v285_v49 = vsel %vm284_vm13, 1, %v1209_v0  ;;  %v298_v39 = vmul.u32 %v296_v30, %v1339_v29 }
  0xa7   :  { %v300_v50 = vmul.u32 %v296_v30, %v273_v1  ;;  %v139_v51 = vadd.s32 %v138_v41, %v129_v14  ;;  %v287_v48 = vadd.s32 %v285_v49, %v279_v43  ;;  %v302_v52 = vshll.u32 %v299_v38, 16 }
  0xa8   :  { %vm288_vm15 = vc.u32 %v286_v12, %v282_v45  ;;  %v301_v53 = vmul.u32 %v297_v9, %v273_v1  ;;  %v151_v54 = vshrl.u32 %v146_v63, 16  ;;  %v160_v55 = vadd.s32 %v159_v36, %v149_v44 }
  0xa9   :  { %v289_v56 = vsel %vm288_vm15, 1, %v1209_v0  ;;  %v158_v57 = vadd.s32 %v154_v19, %v150_v26  ;;  %v281_v42 = vshrl.u32 %v277_v23, 16  ;;  %vm306_vm0 = vc.u32 %v298_v39, %v302_v52 }
  0xaa   :  { %v291_v58 = vadd.s32 %v289_v56, %v287_v48  ;;  %v161_v59 = vadd.s32 %v160_v55, %v151_v54  ;;  %v304_v60 = vshll.u32 %v300_v50, 16  ;;  %v307_v61 = vsel %vm306_vm0, 1, %v1209_v0 }
  0xab   :  { %v308_v62 = vadd.s32 %v302_v52, %v298_v39  ;;  %vm164_vm1 = vc.u32 %v139_v51, %v158_v57  ;;  %v309_v2 = vadd.s32 %v307_v61, %v301_v53  ;;  %v260_v1 = vsel %vm258_vm8, %v1363_v47, 2102212464 }
  0xac   :  { %v292_v29 = vadd.s32 %v291_v58, %v281_v42  ;;  %v165_v63 = vadd.s32 1, %v161_v59  ;;  %v162_v3 = vmul.u32 %v1278_v22, %v1330_v18  ;;  %v239_v7 = vshrl.u32 %v1210_v25, %v1336_v28 }
  0xad   :  { %vm310_vm2 = vc.u32 %v308_v62, %v304_v60  ;;  %v283_v8 = vshrl.u32 %v278_v40, 16  ;;  %v303_v15 = vshrl.u32 %v299_v38, 16  ;;  %v261_v47 = vsel %vm257_vm9, %v1361_v33, %v260_v1 }
  0xae   :  { %v311_v9 = vsel %vm310_vm2, 1, %v1209_v0  ;;  %v166_v10 = vsel %vm164_vm1, %v165_v63, %v161_v59  ;;  %v259_v21 = vsel %vm255_vm7, %v239_v7, %v1359_v46  ;;  %v305_v22 = vshrl.u32 %v300_v50, 16 }
  0xaf   :  { %v313_v17 = vadd.s32 %v311_v9, %v309_v2  ;;  %v167_v23 = vadd.s32 %v166_v10, %v162_v3  ;;  %v293_v30 = vadd.s32 %v292_v29, %v283_v8  ;;  %v312_v25 = vadd.s32 %v308_v62, %v304_v60 }
  0xb0   :  { %v262_v0 = vsel %vm256_vm10, %v259_v21, %v261_v47  ;;  %v163_v43 = vadd.s32 %v158_v57, %v139_v51  ;;  %vm71_vm8 = vcmp.lt.s32.totalorder %v1268_v5, 0  ;;  %vm1448_vm9 = vcmp.le.f32.partialorder %v69_v6, 0.7853982 }
  0xb1   :  { %v314_v18 = vadd.s32 %v313_v17, %v303_v15  ;;  %v168_v24 = vadd.s32 536870912, %v167_v23  ;;  %vm318_vm3 = vc.u32 %v293_v30, %v312_v25  ;;  %v316_v46 = vmul.u32 %v1320_v11, %v262_v0 }
  0xb2   :  { %v317_v59 = vadd.s32 %v312_v25, %v293_v30  ;;  %vm225_vm10 = vcmp.lt.s32.totalorder %v1274_v13, 0  ;;  %vm1461_vm11 = vcmp.le.f32.partialorder %v223_v16, 0.7853982 }
  0xb3   :  { %v315_v28 = vadd.s32 %v314_v18, %v305_v22  ;;  %v1438_v32 = vshrl.u32 %v168_v24, 30 }
  0xb5   :  { %v319_v34 = vadd.s32 1, %v315_v28  ;;  %v170_v26 = vshll.u32 %v1438_v32, 30  ;;  %v193_v6 = vsub.s32 4, %v1438_v32 }
  0xb7   :  { %v320_v35 = vsel %vm318_vm3, %v319_v34, %v315_v28  ;;  %v171_v33 = vsub.s32 %v167_v23, %v170_v26  ;;  %v194_v0 = vsel %vm71_vm8, %v193_v6, %v1438_v32 }
  0xb8   :  { %v321_v37 = vadd.s32 %v320_v35, %v316_v46  ;;  %v196_v16 = vsel %vm1448_vm9, 0, %v194_v0 }
  0xb9   :  { %vm172_vm4 = vcmp.lt.s32.totalorder %v171_v33, 0  ;;  %v173_v4 = vsub.s32 0, %v171_v33 }
  0xba   :  { %v322_v19 = vadd.s32 536870912, %v321_v37 }
  0xbb   :  { %v174_v38 = vsel %vm172_vm4, %v173_v4, %v171_v33 }
  0xbc   :  { %v175_v14 = vclz %v174_v38  ;;  %v1442_v20 = vshrl.u32 %v322_v19, 30 }
  0xbe   :  { %v974_v31 = vadd.s32 4294967294, %v175_v14  ;;  %v324_v40 = vshll.u32 %v1442_v20, 30  ;;  %v347_v46 = vsub.s32 4, %v1442_v20 }
  0xc0   :  { %vm975_vm5 = vcmp.lt.s32.totalorder %v974_v31, 0  ;;  %v325_v12 = vsub.s32 %v321_v37, %v324_v40  ;;  %v348_v19 = vsel %vm225_vm10, %v347_v46, %v1442_v20 }
  0xc1   :  { %v178_v41 = vsel %vm975_vm5, 0, %v974_v31 }
  0xc2   :  { %v179_v11 = vsub.s32 32, %v178_v41  ;;  %v183_v44 = vsub.s32 4294967266, %v178_v41  ;;  %vm326_vm6 = vcmp.lt.s32.totalorder %v325_v12, 0  ;;  %v327_v27 = vsub.s32 0, %v325_v12 }
  0xc3   :  { %v180_v45 = vshll.u32 %v171_v33, %v178_v41  ;;  %v521_v41 = vadd.s32 3, %v196_v16 }
  0xc4   :  { %v181_v36 = vshrl.u32 %v163_v43, %v179_v11  ;;  %v184_v49 = vadd.s32 127, %v183_v44  ;;  %v328_v39 = vsel %vm326_vm6, %v327_v27, %v325_v12  ;;  %v213_v27 = vand.u32 3, %v196_v16 }
  0xc5   :  { %v329_v52 = vclz %v328_v39 }
  0xc6   :  { %v182_v50 = vor.u32 %v181_v36, %v180_v45  ;;  %v185_v48 = vshll.u32 %v184_v49, 23  ;;  %vm214_vm12 = vcmp.lt.s32.totalorder %v213_v27, 2  ;;  %vm215_vm13 = vcmp.eq.s32.totalorder %v213_v27, 0 }
  0xc7   :  { %v977_v54 = vadd.s32 4294967294, %v329_v52  ;;  %vm218_vm14 = vcmp.eq.s32.totalorder %v213_v27, 2 }
  0xc8   :  { %v186_v53 = vor.u32 4788187, %v185_v48  ;;  %v189_v56 = vcvt.s32.f32 %v182_v50  ;;  %v522_v50 = vand.u32 3, %v521_v41 }
  0xc9   :  { %vm978_vm7 = vcmp.lt.s32.totalorder %v977_v54, 0 }
  0xca   :  { %v187_v55 = vand.u32 2147483647, %v186_v53  ;;  %v332_v42 = vsel %vm978_vm7, 0, %v977_v54  ;;  %vm523_vm15 = vcmp.lt.s32.totalorder %v522_v50, 2  ;;  %vm524_vm0 = vcmp.eq.s32.totalorder %v522_v50, 0 }
  0xcb   :  { %v333_v51 = vsub.s32 32, %v332_v42  ;;  %v337_v57 = vsub.s32 4294967266, %v332_v42  ;;  %v334_v61 = vshll.u32 %v325_v12, %v332_v42  ;;  %v350_v12 = vsel %vm1461_vm11, 0, %v348_v19 }
  0xcc   :  { %v190_v58 = vmul.f32 %v189_v56, %v187_v55  ;;  %v676_v39 = vadd.s32 3, %v350_v12  ;;  %v367_v53 = vand.u32 3, %v350_v12  ;;  %vm527_vm4 = vcmp.eq.s32.totalorder %v522_v50, 2 }
  0xcd   :  { %v335_v62 = vshrl.u32 %v317_v59, %v333_v51  ;;  %v338_v29 = vadd.s32 127, %v337_v57 }
  0xce   :  { %v191_v60 = vxor.u32 2147483648, %v190_v58  ;;  %v677_v42 = vand.u32 3, %v676_v39  ;;  %vm368_vm1 = vcmp.lt.s32.totalorder %v367_v53, 2  ;;  %vm369_vm2 = vcmp.eq.s32.totalorder %v367_v53, 0 }
  0xcf   :  { %v336_v63 = vor.u32 %v335_v62, %v334_v61  ;;  %v339_v3 = vshll.u32 %v338_v29, 23  ;;  %vm372_vm3 = vcmp.eq.s32.totalorder %v367_v53, 2 }
  0xd0   :  { %v192_v1 = vsel %vm71_vm8, %v191_v60, %v190_v58  ;;  %vm678_vm5 = vcmp.lt.s32.totalorder %v677_v42, 2  ;;  %vm679_vm6 = vcmp.eq.s32.totalorder %v677_v42, 0  ;;  %vm682_vm7 = vcmp.eq.s32.totalorder %v677_v42, 2 }
  0xd1   :  { %v195_v7 = vsel %vm1448_vm9, %v1268_v5, %v192_v1  ;;  %v340_v9 = vor.u32 4788187, %v339_v3  ;;  %v343_v21 = vcvt.s32.f32 %v336_v63  ;;  %vm212_vm8 = vweird.f32 %v1268_v5  ;;  %v1122_v5 = vld [vmem:[%s1496_s3] ss:$0 sm:$0xff] }
  0xd2   :  { %v197_v8 = vmul.f32 %v195_v7, %v195_v7  ;;  %vm366_vm9 = vweird.f32 %v1274_v13 }
  0xd3   :  { %v341_v17 = vand.u32 2147483647, %v340_v9 }
  0xd4   :  { %v198_v10 = vmul.f32 -0.001358992, %v197_v8  ;;  %v205_v15 = vmul.f32 -0.00019511016, %v197_v8 }
  0xd5   :  { %v344_v30 = vmul.f32 %v343_v21, %v341_v17 }
  0xd6   :  { %v199_v47 = vadd.f32 0.041655596, %v198_v10  ;;  %v206_v23 = vadd.f32 0.008332121, %v205_v15 }
  0xd7   :  { %v345_v24 = vxor.u32 2147483648, %v344_v30 }
  0xd8   :  { %v200_v22 = vmul.f32 %v199_v47, %v197_v8  ;;  %v207_v18 = vmul.f32 %v206_v23, %v197_v8 }
  0xd9   :  { %v346_v34 = vsel %vm225_vm10, %v345_v24, %v344_v30 }
  0xda   :  { %v208_v28 = vadd.f32 -0.16666654, %v207_v18  ;;  %v349_v26 = vsel %vm1461_vm11, %v1274_v13, %v346_v34  ;;  %v201_v35 = vadd.f32 -0.4999988, %v200_v22 }
  0xdb   :  { %v351_v37 = vmul.f32 %v349_v26, %v349_v26 }
  0xdc   :  { %v209_v33 = vmul.f32 %v208_v28, %v197_v8  ;;  %v202_v32 = vmul.f32 %v201_v35, %v197_v8 }
  0xdd   :  { %v352_v38 = vmul.f32 -0.001358992, %v351_v37  ;;  %v359_v14 = vmul.f32 -0.00019511016, %v351_v37 }
  0xde   :  { %v210_v4 = vadd.f32 1.0, %v209_v33  ;;  %v203_v45 = vadd.f32 1.0, %v202_v32 }
  0xdf   :  { %v353_v31 = vadd.f32 0.041655596, %v352_v38  ;;  %v360_v40 = vadd.f32 0.008332121, %v359_v14 }
  0xe0   :  { %v211_v43 = vmul.f32 %v210_v4, %v195_v7  ;;  %v219_v54 = vxor.u32 2147483648, %v203_v45 }
  0xe1   :  { %v354_v11 = vmul.f32 %v353_v31, %v351_v37  ;;  %v361_v44 = vmul.f32 %v360_v40, %v351_v37 }
  0xe2   :  { %v216_v48 = vxor.u32 2147483648, %v211_v43  ;;  %v220_v60 = vsel %vm218_vm14, %v219_v54, %v211_v43  ;;  %v529_v62 = vsel %vm527_vm4, %v219_v54, %v211_v43 }
  0xe3   :  { %v355_v36 = vadd.f32 -0.4999988, %v354_v11  ;;  %v362_v49 = vadd.f32 -0.16666654, %v361_v44 }
  0xe4   :  { %v217_v58 = vsel %vm215_vm13, %v203_v45, %v216_v48  ;;  %v526_v57 = vsel %vm524_vm0, %v203_v45, %v216_v48 }
  0xe5   :  { %v356_v20 = vmul.f32 %v355_v36, %v351_v37  ;;  %v363_v52 = vmul.f32 %v362_v49, %v351_v37  ;;  %v221_v29 = vsel %vm214_vm12, %v217_v58, %v220_v60  ;;  %v530_v2 = vsel %vm523_vm15, %v526_v57, %v529_v62 }
  0xe6   :  { %v222_v10 = vsel %vm212_vm8, nan, %v221_v29  ;;  %v531_v17 = vsel %vm212_vm8, nan, %v530_v2 }
  0xe7   :  { %v357_v55 = vadd.f32 1.0, %v356_v20  ;;  %v364_v56 = vadd.f32 1.0, %v363_v52 }
  0xe9   :  { %v365_v59 = vmul.f32 %v364_v56, %v349_v26  ;;  %v373_v51 = vxor.u32 2147483648, %v357_v55 }
  0xeb   :  { %v370_v61 = vxor.u32 2147483648, %v365_v59  ;;  %v374_v63 = vsel %vm372_vm3, %v373_v51, %v365_v59  ;;  %v684_v7 = vsel %vm682_vm7, %v373_v51, %v365_v59 }
  0xed   :  { %v371_v1 = vsel %vm369_vm2, %v357_v55, %v370_v61  ;;  %v681_v3 = vsel %vm679_vm6, %v357_v55, %v370_v61 }
  0xee   :  { %v375_v8 = vsel %vm368_vm1, %v371_v1, %v374_v63  ;;  %v685_v9 = vsel %vm678_vm5, %v681_v3, %v684_v7 }
  0xef   :  { %v376_v15 = vsel %vm366_vm9, nan, %v375_v8  ;;  %v686_v21 = vsel %vm366_vm9, nan, %v685_v9 }
  0xf0   :  { %v687_v6 = vpack.c.bf16 %v376_v15, %v222_v10  ;;  %v688_v47 = vpack.c.bf16 %v686_v21, %v531_v17 }
  0xf2   :  { %829 = vmatmul.bf16.vlgmr.msra.gmra.mxu0 %v687_v6  ;;  %843 = vmatmul.bf16.vlgmr.msra.gmra.mxu1 %v688_v47 }
 0x16f   :  { %v830_v13 = vpop.f32.mrf.mxu0  ;;  %v844_v23 = vpop.f32.mrf.mxu1 }
 0x170   :  { %v831_v30 = vadd.f32 %v1122_v5, %v830_v13 }
 0x172   :  { %v845_v22 = vadd.f32 %v844_v23, %v831_v30 }
 0x174   :  { %v849_v18 = vmul.f32 0.5, %v845_v22 }
 0x176   :  { %1123 = vtanh.f32 %v849_v18 }
 0x177   :  { %v832_v24 = vpop.f32.mrf.mxu0  ;;  %v846_v0 = vpop.f32.mrf.mxu1 }
 0x178   :  { %v833_v25 = vadd.f32 %v1122_v5, %v832_v24 }
 0x17a   :  { %v847_v28 = vadd.f32 %v846_v0, %v833_v25 }
 0x17c   :  { %v1124_v34 = vpop.eup %1123  ;;  %v850_v46 = vmul.f32 0.5, %v847_v28 }
 0x17d   :  { %v853_v26 = vmul.f32 0.5, %v1124_v34 }
 0x17e   :  { %1125 = vtanh.f32 %v850_v46 }
 0x17f   :  { %v855_v35 = vadd.f32 0.5, %v853_v26 }
 0x181   :  { %v857_v33 = vmul.f32 %v855_v35, %v845_v22 }
 0x184   :  { %v1126_v37 = vpop.eup %1125 }
 0x185   :  { %v854_v16 = vmul.f32 0.5, %v1126_v37 }
 0x187   :  { %v856_v4 = vadd.f32 0.5, %v854_v16 }
 0x189   :  { %v858_v19 = vmul.f32 %v856_v4, %v847_v28 }
 0x18a   :  { %1202 = dma.done.wait [#allocation3], 1024 }
 0x18b   :  { %1203 = vsyncadd [#allocation3], 4294966272  ;;  %v1105_v38 = vld [vmem:[#allocation2 + $0x38] sm:$0xff]  ;;  %v1104_v14 = vld [vmem:[#allocation2 + $0x30] sm:$0xff]  ;;  %v863_v11 = vpack.c.bf16 %v858_v19, %v857_v33  ;;  %s1217_s14 = smov [#allocation7]   ;;  %s954_s18 = sshll.u32 %s1499_s6, 4  ;;  %s955_s18 = int_to_ptr.hbm [resolvable:$true] %s954_s18 }
 0x18c   :  { %932 = vmatpush.bf16.msra.mxu2 %v1105_v38  ;;  %v1103_v32 = vld [vmem:[#allocation2 + $0x28] sm:$0xff]  ;;  %v1102_v31 = vld [vmem:[#allocation2 + $0x20] sm:$0xff]  ;;  %v1101_v40 = vld [vmem:[#allocation2 + $0x18] sm:$0xff]  ;;  %s952_s15 = sshll.u32 %s1217_s14, 4  ;;  %s1218_s19 = smov 128   ;;  %s953_s15 = int_to_ptr.vmem [resolvable:$true] %s952_s15 }
 0x18d   :  { %v1100_v12 = vld [vmem:[#allocation2 + $0x10] sm:$0xff]  ;;  %v1099_v41 = vld [vmem:[#allocation2 + $0x8] sm:$0xff]  ;;  %v1098_v43 = vld [vmem:[#allocation2] sm:$0xff]  ;;  %s1219_s20 = smov 8  }
 0x18e   :  { %v1127_v44 = vld [vmem:[%s1498_s5] ss:$0 sm:$0xff] }
 0x190   :  { %933 = vmatpush.bf16.msra.mxu2 %v1104_v14 }
 0x194   :  { %934 = vmatpush.bf16.msra.mxu2 %v1103_v32 }
 0x198   :  { %935 = vmatpush.bf16.msra.mxu2 %v1102_v31 }
 0x19c   :  { %936 = vmatpush.bf16.msra.mxu2 %v1101_v40 }
 0x1a0   :  { %937 = vmatpush.bf16.msra.mxu2 %v1100_v12 }
 0x1a4   :  { %938 = vmatpush.bf16.msra.mxu2 %v1099_v41 }
 0x1a8   :  { %939 = vmatpush.bf16.msra.mxu2 %v1098_v43 }
 0x1ab   :  { %940 = vmatmul.bf16.vlgmr.msra.gmra.mxu2 %v863_v11 }
 0x22e   :  { %v941_v27 = vpop.f32.mrf.mxu2 }
 0x22f   :  { %v942_v45 = vadd.f32 %v1127_v44, %v941_v27 }
 0x231   :  { %946 = vst [vmem:[#allocation7] sm:$0xff] %v942_v45 }
 0x236   :  { %v943_v36 = vpop.f32.mrf.mxu2 }
 0x237   :  { %v944_v49 = vadd.f32 %v1127_v44, %v943_v36 }
 0x239   :  { %947 = vst [vmem:[#allocation7 + $0x8] sm:$0xff] %v944_v49 }
 0x23a   :  { %960 = dma.vmem_to_hbm [thread:$0]  %s953_s15, 256, %s955_s18, [#allocation6], %s1218_s19, %s1218_s19, %s1219_s20  }
 0x23b   :  { %1204 = dma.done.wait [#allocation6], 256  }
 0x23c   :  { %1205 = vsyncadd [#allocation6], 4294967040 }
 0x23d   :  { %965 = vsyncpa [#allocation5], 1 }
 0x23e   :  { %966 = vsyncpa [#allocation6], 1 }
 0x23f   :  { %967 = vsyncmov [#allocation3] }
 0x242   :  { %s968_s5 = vpop.sfrf %967 }
 0x243   :  { %p1081_p0 = scmp.ne.s32.totalorder %s968_s5, 0 }
 0x245   :  { %972 = shalt.err (%p1081_p0)  }

</bundles_post_ra>
